<compile_context>
chip_gen: v7x
topology: tpu7x:2x2x1
jax: 0.10.0
libtpu: 0.0.40
codegen_flags: <defaults>
</compile_context>

<pallas_src>
import functools

import jax
import jax.numpy as jnp
from jax.experimental import pallas as pl
from jax.experimental.pallas import tpu as pltpu

_LANE = 128   # lane width (last-dim alignment)
_SUBLANE = 8  # sublane height for 32-bit dtypes


def _round_up(n, m):
    return (n + m - 1) // m * m


def dqn_kernel(x_ref, w1_ref, b1_ref, w2_ref, b2_ref, o_ref):
    # Cast x to the matmul dtype in-kernel (avoids a wrapper-side bf16 copy of
    # the whole batch); MXU accumulates in f32; bias + ReLU on the VPU in f32.
    x = x_ref[...].astype(w1_ref.dtype)
    h = jnp.dot(x, w1_ref[...], preferred_element_type=jnp.float32)
    h = jnp.maximum(h + b1_ref[...], 0.0)
    out = jnp.dot(h.astype(w2_ref.dtype), w2_ref[...],
                  preferred_element_type=jnp.float32)
    o_ref[...] = (out + b2_ref[...]).astype(o_ref.dtype)


def prepare_dqn_params(w1, b1, w2, b2, matmul_dtype=jnp.bfloat16):
    """One-time cast + lane-pad of the weights (hoisted out of the call path).

    H is zero-padded to a multiple of 128 (exact: padded ReLU columns feed
    zero rows of W2).  The contraction dim S and the output dim A are left
    unpadded — blocks equal to the full array dim are legal, and the tiny
    A keeps output HBM traffic minimal.  matmul_dtype=float32 is the exact
    (slower) escape hatch if this feeds TD-target computation.
    """
    S, H = w1.shape
    A = w2.shape[1]
    H_p = _round_up(H, _LANE)
    w1p = jnp.zeros((S, H_p), matmul_dtype).at[:, :H].set(w1.astype(matmul_dtype))
    b1p = jnp.zeros((1, H_p), jnp.float32).at[:, :H].set(
        b1.astype(jnp.float32)[None, :])
    w2p = jnp.zeros((H_p, A), matmul_dtype).at[:H, :].set(w2.astype(matmul_dtype))
    b2p = b2.astype(jnp.float32)[None, :]
    return w1p, b1p, w2p, b2p


@functools.partial(jax.jit, static_argnames=("batch_tile",))
def dqn_forward(x, w1p, b1p, w2p, b2p, *, batch_tile=512):
    """y = relu(x @ W1 + b1) @ W2 + b2, with params from prepare_dqn_params."""
    B, S = x.shape
    S_w, H_p = w1p.shape
    assert S_w == S, "x feature dim must match prepared W1"
    A = w2p.shape[1]
    out_dtype = x.dtype

    # Sublane multiple for the x block is set by x's (un-copied) dtype:
    # 8 for 32-bit, 16 for 16-bit, 32 for 8-bit inputs.
    sub = max(_SUBLANE, 32 // jnp.dtype(x.dtype).itemsize)
    b_r = _round_up(B, sub)
    tile = min(_round_up(batch_tile, sub), b_r)
    # v7x has 2 TensorCores: if a single tile would cover the whole batch,
    # split it so the "parallel" axis has >=2 grid steps to shard across cores.
    if tile >= b_r and b_r >= 2 * sub:
        tile = _round_up(pl.cdiv(b_r, 2), sub)

    grid = (pl.cdiv(B, tile),)

    return pl.pallas_call(
        dqn_kernel,
        out_shape=jax.ShapeDtypeStruct((B, A), out_dtype),
        grid_spec=pltpu.PrefetchScalarGridSpec(
            num_scalar_prefetch=0,
            grid=grid,
            in_specs=[
                pl.BlockSpec((tile, S), lambda i: (i, 0)),   # x rows (orig dtype)
                pl.BlockSpec((S, H_p), lambda i: (0, 0)),    # W1 (VMEM-resident)
                pl.BlockSpec((1, H_p), lambda i: (0, 0)),    # b1 (resident)
                pl.BlockSpec((H_p, A), lambda i: (0, 0)),    # W2 (resident)
                pl.BlockSpec((1, A), lambda i: (0, 0)),      # b2 (resident)
            ],
            # Unpadded (tile, A) output block: last dim equals the full array
            # dim, so it is legal; ~16x less output HBM traffic than a
            # 128-lane-padded f32 slab and no trailing slice.
            out_specs=pl.BlockSpec((tile, A), lambda i: (i, 0)),
        ),
        compiler_params=pltpu.CompilerParams(
            dimension_semantics=("parallel",)),
    )(x, w1p, b1p, w2p, b2p)


def init_dqn_params(key, state_dim, hidden_dim, action_dim, dtype=jnp.float32):
    """Deterministic init mimicking nn.Linear's U(-1/sqrt(fan_in), +1/sqrt(fan_in))."""
    k1, k2, k3, k4 = jax.random.split(key, 4)
    lim1 = 1.0 / jnp.sqrt(jnp.asarray(state_dim, jnp.float32))
    lim2 = 1.0 / jnp.sqrt(jnp.asarray(hidden_dim, jnp.float32))
    w1 = jax.random.uniform(k1, (state_dim, hidden_dim), dtype, -lim1, lim1)
    b1 = jax.random.uniform(k2, (hidden_dim,), dtype, -lim1, lim1)
    w2 = jax.random.uniform(k3, (hidden_dim, action_dim), dtype, -lim2, lim2)
    b2 = jax.random.uniform(k4, (action_dim,), dtype, -lim2, lim2)
    return w1, b1, w2, b2


def _reference_f32(x, w1, b1, w2, b2):
    return jnp.maximum(x @ w1 + b1, 0.0) @ w2 + b2


if __name__ == "__main__":
    # Small shapes consistent with the module: DQN(state_dim=32, action_dim=8,
    # hidden_dim=[256]) applied to a batch of 8 states.
    batch, state_dim, hidden_dim, action_dim = 8, 32, 256, 8

    key = jax.random.PRNGKey(0)
    kx, kp, kx2 = jax.random.split(key, 3)
    x = jax.random.normal(kx, (batch, state_dim), jnp.float32)
    w1, b1, w2, b2 = init_dqn_params(kp, state_dim, hidden_dim, action_dim)

    # One-time weight preparation (pad + cast hoisted out of the call path).
    params = prepare_dqn_params(w1, b1, w2, b2)

    out = dqn_forward(x, *params)
    out = jax.block_until_ready(out)
    assert out.shape == (batch, action_dim)

    # Reference 1: bf16-consistent (same matmul-input precision as the kernel).
    xb, w1b, w2b = (t.astype(jnp.bfloat16) for t in (x, w1, w2))
    h_ref = jnp.maximum(
        jnp.dot(xb, w1b, preferred_element_type=jnp.float32) + b1, 0.0)
    ref_bf16 = jnp.dot(h_ref.astype(jnp.bfloat16), w2b,
                       preferred_element_type=jnp.float32) + b2
    assert jnp.allclose(out, ref_bf16, atol=1e-3, rtol=1e-3), \
        "mismatch vs bf16-consistent reference"

    # Reference 2: pure f32 math (loose tolerance for bf16 matmul inputs).
    ref_f32 = _reference_f32(x, w1, b1, w2, b2)
    assert jnp.allclose(out, ref_f32, atol=2e-2, rtol=2e-2), \
        "mismatch vs f32 reference"

    # Larger, non-multiple-of-tile batch: exercises the multi-step grid
    # (>=2 steps for v7x megacore) and the masked partial last block.
    batch2 = 100
    x2 = jax.random.normal(kx2, (batch2, state_dim), jnp.float32)
    out2 = jax.block_until_ready(dqn_forward(x2, *params))
    assert out2.shape == (batch2, action_dim)
    ref2 = _reference_f32(x2, w1, b1, w2, b2)
    assert jnp.allclose(out2, ref2, atol=2e-2, rtol=2e-2), \
        "mismatch vs f32 reference (batch=100)"

    print("KERNEL_OK")
</pallas_src>

<mosaic_0001>
module attributes {stable_mosaic.version = 11 : i64} {
  func.func @dqn_kernel(%arg0: i32, %arg1: memref<8x32xf32, #tpu.memory_space<vmem>>, %arg2: memref<32x256xbf16, #tpu.memory_space<vmem>>, %arg3: memref<1x256xf32, #tpu.memory_space<vmem>>, %arg4: memref<256x8xbf16, #tpu.memory_space<vmem>>, %arg5: memref<1x8xf32, #tpu.memory_space<vmem>>, %arg6: memref<8x8xf32, #tpu.memory_space<vmem>>) attributes {dimension_semantics = [#tpu.dimension_semantics<parallel>], iteration_bounds = array<i64: 1>, scalar_prefetch = 0 : i64, scratch_operands = 0 : i64, tpu.core_type = #tpu.core_type<tc>, window_params = [{transform_indices = @transform_0, window_bounds = array<i64: 8, 32>}, {pipeline_mode = #tpu.pipeline_mode<synchronous>, transform_indices = @transform_1, window_bounds = array<i64: 32, 256>}, {pipeline_mode = #tpu.pipeline_mode<synchronous>, transform_indices = @transform_2, window_bounds = array<i64: 1, 256>}, {pipeline_mode = #tpu.pipeline_mode<synchronous>, transform_indices = @transform_3, window_bounds = array<i64: 256, 8>}, {pipeline_mode = #tpu.pipeline_mode<synchronous>, transform_indices = @transform_4, window_bounds = array<i64: 1, 8>}, {transform_indices = @transform_5, window_bounds = array<i64: 8, 8>}]} {
    %c0 = arith.constant 0 : index
    %c0_0 = arith.constant 0 : index
    %0 = vector.load %arg1[%c0, %c0_0] : memref<8x32xf32, #tpu.memory_space<vmem>>, vector<8x32xf32>
    %1 = arith.truncf %0 : vector<8x32xf32> to vector<8x32xbf16>
    %c0_1 = arith.constant 0 : index
    %c0_2 = arith.constant 0 : index
    %2 = vector.load %arg2[%c0_1, %c0_2] : memref<32x256xbf16, #tpu.memory_space<vmem>>, vector<32x256xbf16>
    %cst = arith.constant dense<0.000000e+00> : vector<8x256xf32>
    %3 = tpu.matmul %1, %2, %cst {dimension_numbers = #tpu.dot_dimension_numbers<[1], [0], [0], [1], [0, 0, 1, 1], [], []>} : vector<8x32xbf16>, vector<32x256xbf16>, vector<8x256xf32> -> vector<8x256xf32>
    %c0_3 = arith.constant 0 : index
    %c0_4 = arith.constant 0 : index
    %4 = vector.load %arg3[%c0_3, %c0_4] : memref<1x256xf32, #tpu.memory_space<vmem>>, vector<1x256xf32>
    %5 = vector.broadcast %4 : vector<1x256xf32> to vector<8x256xf32>
    %6 = arith.addf %3, %5 : vector<8x256xf32>
    %cst_5 = arith.constant 0.000000e+00 : f32
    %7 = vector.broadcast %cst_5 : f32 to vector<8x256xf32>
    %8 = arith.maximumf %6, %7 : vector<8x256xf32>
    %9 = arith.truncf %8 : vector<8x256xf32> to vector<8x256xbf16>
    %c0_6 = arith.constant 0 : index
    %c0_7 = arith.constant 0 : index
    %10 = vector.load %arg4[%c0_6, %c0_7] : memref<256x8xbf16, #tpu.memory_space<vmem>>, vector<256x8xbf16>
    %cst_8 = arith.constant dense<0.000000e+00> : vector<8x8xf32>
    %11 = tpu.matmul %9, %10, %cst_8 {dimension_numbers = #tpu.dot_dimension_numbers<[1], [0], [0], [1], [0, 0, 1, 1], [], []>} : vector<8x256xbf16>, vector<256x8xbf16>, vector<8x8xf32> -> vector<8x8xf32>
    %c0_9 = arith.constant 0 : index
    %c0_10 = arith.constant 0 : index
    %12 = vector.load %arg5[%c0_9, %c0_10] : memref<1x8xf32, #tpu.memory_space<vmem>>, vector<1x8xf32>
    %13 = vector.broadcast %12 : vector<1x8xf32> to vector<8x8xf32>
    %14 = arith.addf %11, %13 : vector<8x8xf32>
    %c0_11 = arith.constant 0 : index
    %c0_12 = arith.constant 0 : index
    %15 = vector.load %arg6[%c0_11, %c0_12] : memref<8x8xf32, #tpu.memory_space<vmem>>, vector<8x8xf32>
    tpu.vector_store %arg6[%c0_11, %c0_12], %14 {strides = array<i32>} : memref<8x8xf32, #tpu.memory_space<vmem>>, vector<8x8xf32>,
    return
  }
  func.func @transform_0(%arg0: i32) -> (i32, i32) {
    %c0_i32 = arith.constant 0 : i32
    %c0_i32_0 = arith.constant 0 : i32
    return %arg0, %c0_i32 : i32, i32
  }
  func.func @transform_1(%arg0: i32) -> (i32, i32) {
    %c0_i32 = arith.constant 0 : i32
    %c0_i32_0 = arith.constant 0 : i32
    %c0_i32_1 = arith.constant 0 : i32
    return %c0_i32, %c0_i32_0 : i32, i32
  }
  func.func @transform_2(%arg0: i32) -> (i32, i32) {
    %c0_i32 = arith.constant 0 : i32
    %c0_i32_0 = arith.constant 0 : i32
    %c0_i32_1 = arith.constant 0 : i32
    return %c0_i32, %c0_i32_0 : i32, i32
  }
  func.func @transform_3(%arg0: i32) -> (i32, i32) {
    %c0_i32 = arith.constant 0 : i32
    %c0_i32_0 = arith.constant 0 : i32
    %c0_i32_1 = arith.constant 0 : i32
    return %c0_i32, %c0_i32_0 : i32, i32
  }
  func.func @transform_4(%arg0: i32) -> (i32, i32) {
    %c0_i32 = arith.constant 0 : i32
    %c0_i32_0 = arith.constant 0 : i32
    %c0_i32_1 = arith.constant 0 : i32
    return %c0_i32, %c0_i32_0 : i32, i32
  }
  func.func @transform_5(%arg0: i32) -> (i32, i32) {
    %c0_i32 = arith.constant 0 : i32
    %c0_i32_0 = arith.constant 0 : i32
    return %arg0, %c0_i32 : i32, i32
  }
}

</mosaic_0001>

<bundles_post_ra>
// kernel: dqn_forward.1
= control target key start
LH: loop header
LB: loop body
LE: loop exit
PB: predicated region body
PF: predicated region fallthrough
CT: control target
= control target key end

     0   :  { %v392_v2 = vmov 0   ;;  %vm60_vm0 = vcmask 261120   ;;  %s505_s0 = inlined_call_operand.vmem [shape: f32[8,32], index: 0, kind: input, shape index: {}]   ;;  %s506_s1 = inlined_call_operand.vmem [shape: bf16[32,256], index: 1, kind: input, shape index: {}]   ;;  %s507_s2 = inlined_call_operand.vmem [shape: f32[1,256], index: 2, kind: input, shape index: {}]   ;;  %s508_s3 = inlined_call_operand.vmem [shape: bf16[256,8], index: 3, kind: input, shape index: {}]   ;;  %s509_s4 = inlined_call_operand.vmem [shape: f32[1,8], index: 4, kind: input, shape index: {}]   ;;  %s510_s5 = inlined_call_operand.hbm [shape: f32[8,8], index: 5, kind: output, shape index: {}]  }
   0x1   :  { %v346_v0 = vld [vmem:[%s506_s1 + $0x4] ss:$8 sps:$4 sm:$0xff]   ;;  %v348_v1 = vld [vmem:[%s506_s1] ss:$8 sps:$4 sm:$0xff]   ;;  %96 = vmatprep.mubr.bf16.mxu0 %v392_v2  ;;  %v349_v3 = vld [vmem:[%s506_s1 + $0x14] ss:$8 sps:$4 sm:$0xff]  }
   0x2   :  { %64 = vmatprep.subr.bf16.mxu0 %v346_v0  ;;  %v351_v4 = vld [vmem:[%s506_s1 + $0x10] ss:$8 sps:$4 sm:$0xff]   ;;  %v22_v5 = vld [vmem:[%s505_s0] sm:$0xff]  ;;  %v354_v8 = vld [vmem:[%s508_s3 + $0x48] sm:$0xff]  }
   0x3   :  { %65 = vmatpush1.bf16.msra.mxu0 %v348_v1  ;;  %v352_v6 = vld [vmem:[%s508_s3 + $0x40] sm:$0xff]   ;;  %v23_v9 = vpack.c.bf16 %v22_v5, %v22_v5  ;;  %v355_v10 = vld [vmem:[%s508_s3 + $0x8] sm:$0xff]   ;;  %v356_v11 = vld [vmem:[%s508_s3 + $0x50] sm:$0xff]  }
   0x4   :  { %66 = vmatprep.subr.bf16.mxu0 %v349_v3  ;;  %v353_v7 = vld [vmem:[%s508_s3] sm:$0xff]   ;;  %322 = vmatprep.subr.bf16.mxu1 %v352_v6  ;;  %v357_v12 = vld [vmem:[%s508_s3 + $0x10] sm:$0xff]   ;;  %v358_v13 = vld [vmem:[%s508_s3 + $0x58] sm:$0xff]  }
   0x5   :  { %323 = vmatpush3.bf16.msra.mxu1 %v353_v7  ;;  %v359_v14 = vld [vmem:[%s508_s3 + $0x18] sm:$0xff]   ;;  %v360_v15 = vld [vmem:[%s508_s3 + $0x60] sm:$0xff]  }
   0x6   :  { %324 = vmatprep.subr.bf16.mxu1 %v354_v8  ;;  %v361_v16 = vld [vmem:[%s508_s3 + $0x20] sm:$0xff]  }
   0x7   :  { %67 = vmatpush1.bf16.msra.mxu0 %v351_v4 }
   0x9   :  { %325 = vmatpush3.bf16.msra.mxu1 %v355_v10 }
   0xa   :  { %304 = vmatmul.mubr.msk.bf16.vlgmr.msra.gmra.mrb[0].mxu0 %vm60_vm0, %v23_v9  ;;  %326 = vmatprep.subr.bf16.mxu1 %v356_v11 }
   0xd   :  { %327 = vmatpush3.bf16.msra.mxu1 %v357_v12 }
   0xe   :  { %328 = vmatprep.subr.bf16.mxu1 %v358_v13 }
  0x11   :  { %329 = vmatpush3.bf16.msra.mxu1 %v359_v14 }
  0x12   :  { %10 = vsyncpa [#allocation3], 0  ;;  %330 = vmatprep.subr.bf16.mxu1 %v360_v15  ;;  %v362_v17 = vld [vmem:[%s508_s3 + $0x68] sm:$0xff]   ;;  %v364_v19 = vld [vmem:[%s508_s3 + $0x70] sm:$0xff]   ;;  %v30_v23 = vlaneseq  ;;  %vm284_vm1 = vcmask 64512  }
  0x13   :  { %v363_v18 = vld [vmem:[%s508_s3 + $0x28] sm:$0xff]   ;;  %v365_v20 = vld [vmem:[%s508_s3 + $0x30] sm:$0xff]   ;;  %v366_v21 = vld [vmem:[%s508_s3 + $0x78] sm:$0xff]  }
  0x14   :  { %v367_v22 = vld [vmem:[%s508_s3 + $0x38] sm:$0xff]   ;;  %v31_v24 = vshrl.u32 %v30_v23, 7  ;;  %v28_v26 = vld [vmem:[%s507_s2] sm:$0x3]  ;;  %s393_s2 = smov [#allocation2]  }
  0x15   :  { %331 = vmatpush3.bf16.msra.mxu1 %v361_v16  ;;  %v305_v41 = vld [vmem:[%s509_s4] ss:$0 sm:$0xff]  ;;  %s292_s0 = sshll.u32 %s393_s2, 4  ;;  %s293_s0 = int_to_ptr.vmem [resolvable:$true] %s292_s0 }
  0x16   :  { %332 = vmatprep.subr.bf16.mxu1 %v362_v17  ;;  %v32_v25 = vsub.s32 0, %v31_v24  ;;  %v36_v27 = vsub.s32 1, %v31_v24  ;;  %s368_s10 = scalar_lea.vmem %s293_s0, 128  ;;  %p373_p1 = scmp.lt.s32.totalorder %s293_s0, %s293_s0 }
  0x17   :  { %p369_p0 = scmp.ne.s32.totalorder %s293_s0, %s368_s10  ;;  %p374_p2 = scmp.lt.s32.totalorder %s368_s10, %s368_s10 }
  0x18   :  { %v33_v28 = vrot.slane %v28_v26, %v32_v25  ;;  %v37_v29 = vrot.slane %v28_v26, %v36_v27 }
  0x19   :  { %333 = vmatpush3.bf16.msra.mxu1 %v363_v18  ;;  %p375_p3 = por %p374_p2, %p373_p1 }
  0x1a   :  { %334 = vmatprep.subr.bf16.mxu1 %v364_v19 }
  0x1b   :  { %p376_p4 = pnand %p375_p3, %p369_p0 }
  0x1d   :  { %335 = vmatpush3.bf16.msra.mxu1 %v365_v20 }
  0x1e   :  { %336 = vmatprep.subr.bf16.mxu1 %v366_v21 }
  0x21   :  { %337 = vmatpush3.bf16.msra.mxu1 %v367_v22 }
  0xdd   :  { %v98_v30 = vpop.f32.mrb[0].mxu0 }
  0xde   :  { %v99_v31 = vadd.f32 %v98_v30, %v33_v28  ;;  %v100_v32 = vpop.f32.mrb[1].mxu0 }
  0xdf   :  { %v101_v33 = vadd.f32 %v100_v32, %v37_v29  ;;  %v102_v34 = vpop.f32.mrb[2].mxu0 }
  0xe0   :  { %v105_v35 = vmax.f32 %v99_v31, 0.0  ;;  %v103_v36 = vpop.f32.mrb[3].mxu0 }
  0xe1   :  { %v106_v37 = vmax.f32 %v101_v33, 0.0 }
  0xe2   :  { %v107_v39 = vpack.c.bf16 %v105_v35, %v105_v35 }
  0xe3   :  { %v108_v38 = vpack.c.bf16 %v106_v37, %v106_v37 }
  0xe5   :  { %276 = vmatprep.mubr.bf16.mxu1 %v108_v38 }
  0xe6   :  { %277 = vmatmul.mubr.bf16.vlgmr.msra.gmra.mrb[0].mxu1 %v107_v39 }
 0x1b9   :  { %v338_v40 = vpop.f32.mrb[0].mxu1 }
 0x1ba   :  { %v339_v42 = vpop.f32.mrb[1].mxu1 }
 0x1bb   :  { %v340_v43 = vadd.f32 %v339_v42, %v338_v40  ;;  %v341_v44 = vpop.f32.mrb[2].mxu1 }
 0x1bc   :  { %v342_v45 = vpop.f32.mrb[3].mxu1 }
 0x1bd   :  { %v279_v46 = vadd.f32 %v340_v43, %v305_v41 }
 0x1bf   :  { %285 = vst.msk [vmem:[#allocation2] sm:$0xff] %vm284_vm1, %v279_v46 }
 0x1c0   :  { %379 = shalt.err (!%p376_p4)
}
 0x1c1   :  { %s380_s4 = scalar_lea.hbm %s510_s5, 128 }
 0x1c2   :  { %p381_p5 = scmp.ne.s32.totalorder %s510_s5, %s380_s4  ;;  %p384_p6 = scmp.lt.u32.totalorder %s380_s4, %s510_s5 }
 0x1c4   :  { %p386_p7 = pnand %p384_p6, %p381_p5 }
 0x1c6   :  { %389 = shalt.err (!%p386_p7)
}
 0x1c7   :  { %295 = dma.vmem_to_hbm [thread:$0]  %s293_s0, 128, %s510_s5, [#allocation3]  }
 0x1c8   :  { %390 = dma.done.wait [#allocation3], 128  }
 0x1c9   :  { %391 = vsyncadd [#allocation3], 4294967168 }
 0x1ca   :  { %299 = vsyncpa [#allocation3], 1 }

</bundles_post_ra>
